<compile_context>
chip_gen: v7x
topology: tpu7x:2x2x1
jax: 0.10.0
libtpu: 0.0.40
codegen_flags: <defaults>
</compile_context>

<pallas_src>
import functools

import jax
import jax.numpy as jnp
import numpy as np
from jax.experimental import pallas as pl
from jax.experimental.pallas import tpu as pltpu


# ---------------------------------------------------------------------------
# torch.view shape bookkeeping (-1 resolution).
# ---------------------------------------------------------------------------
def _resolve_shape(total, shape):
    shape = list(shape)
    if shape.count(-1) > 1:
        raise ValueError("only one -1 allowed in view shape")
    if -1 in shape:
        known = 1
        for s in shape:
            if s != -1:
                known *= s
        shape[shape.index(-1)] = total // known if known else 0
    if int(np.prod(shape)) != total:
        raise ValueError(f"view shape {shape} incompatible with {total} elements")
    return tuple(int(s) for s in shape)


def _sublane_pack(dtype):
    # Native sublane packing per 32-bit vreg row: 8 (4B), 16 (2B), 32 (1B).
    itemsize = jnp.dtype(dtype).itemsize
    return {4: 8, 2: 16, 1: 32}.get(itemsize, 8)


def _pick_width(total):
    """Widest lane-dense W (multiple of 128) that divides `total` exactly."""
    for w in (4096, 2048, 1024, 512, 256, 128):
        if total % w == 0:
            return w
    return None


def _device_kind():
    try:
        return jax.devices()[0].device_kind.lower()
    except Exception:
        return ""


# ---------------------------------------------------------------------------
# Primary path: direct HBM->HBM DMA copy (no VMEM round trip, single step).
# ---------------------------------------------------------------------------
_MAX_DMA_CHUNKS = 4          # a few DMAs in flight is enough to fill HBM BW
_MIN_DMA_CHUNK_BYTES = 1 << 20


def _row_chunks(rows, row_bytes, pack):
    """Split rows into up to _MAX_DMA_CHUNKS contiguous (start, size) pieces,
    each >= ~1 MiB and starting on a sublane-pack-aligned row."""
    min_rows = max(pack, -(-_MIN_DMA_CHUNK_BYTES // row_bytes))
    n = int(min(_MAX_DMA_CHUNKS, max(1, rows // min_rows)))
    if n <= 1:
        return ((0, rows),)
    base = max(pack, (rows // n // pack) * pack)
    chunks, start = [], 0
    for c in range(n):
        size = base if c < n - 1 else rows - start
        if size <= 0:
            break
        chunks.append((start, size))
        start += size
    return tuple(chunks)


def _make_dma_copy_kernel(chunks):
    whole = len(chunks) == 1

    def kernel(x_hbm, o_hbm, sems):
        copies = []
        for c, (start, size) in enumerate(chunks):
            if whole:
                src, dst = x_hbm, o_hbm
            else:
                src = x_hbm.at[pl.ds(start, size)]
                dst = o_hbm.at[pl.ds(start, size)]
            copies.append(pltpu.make_async_copy(src, dst, sems.at[c]))
        for cp in copies:          # launch all, keep them in flight together
            cp.start()
        for cp in copies:
            cp.wait()

    return kernel


def _dma_copy_slab(slab):
    """HBM->HBM copy of a 2-D slab via a few large concurrent DMAs."""
    rows, w = slab.shape
    itemsize = jnp.dtype(slab.dtype).itemsize
    pack = _sublane_pack(slab.dtype)
    chunks = _row_chunks(rows, w * itemsize, pack)
    return pl.pallas_call(
        _make_dma_copy_kernel(chunks),
        out_shape=jax.ShapeDtypeStruct((rows, w), slab.dtype),
        in_specs=[pl.BlockSpec(memory_space=pl.ANY)],
        out_specs=pl.BlockSpec(memory_space=pl.ANY),
        scratch_shapes=[pltpu.SemaphoreType.DMA((len(chunks),))],
        compiler_params=pltpu.CompilerParams(has_side_effects=True),
        cost_estimate=pl.CostEstimate(
            flops=0, transcendentals=0, bytes_accessed=2 * rows * w * itemsize),
    )(slab)


# ---------------------------------------------------------------------------
# Fallback path: tiled HBM->VMEM->HBM copy (chip-aware tile size, cdiv grid).
# ---------------------------------------------------------------------------
def _tile_copy_kernel(x_ref, o_ref):
    o_ref[...] = x_ref[...]


def _target_tile_bytes():
    kind = _device_kind()
    if "v7" in kind:
        return 6 << 20   # 2 specs x 2 bufs x 6 MiB = 24 MiB <= 32 MiB scoped default
    if "v6" in kind:
        return 4 << 20   # 16 MiB <= 32 MiB scoped default
    if "v5" in kind:
        return 3 << 20   # with the raised vmem limit below
    return 2 << 20


def _pick_block_rows(rows, w, itemsize, pack, target_bytes):
    tile_rows = max(pack, (target_bytes // (w * itemsize) // pack) * pack)
    if rows <= tile_rows:
        # Whole array fits in one tile: split in two when cleanly possible so
        # the 1-D grid has length >= 2 (both v7x TCs get work, pipeline
        # overlaps prefetch/writeback); otherwise a single full-rows block.
        half = (rows // 2 // pack) * pack
        if half >= pack and rows % half == 0:
            return half
        return rows                      # block == full rows dim (always legal)
    # Prefer an exact divisor of rows near the target, but never shrink below
    # ~1/4 of the target tile (removes the old collapse-to-4KiB cliff).
    floor = max(pack, tile_rows // 4)
    br = tile_rows
    while br >= floor:
        if rows % br == 0:
            return br
        br -= pack
    return tile_rows                     # cdiv grid, partial edge block


def _tiled_copy_slab(slab):
    rows, w = slab.shape
    itemsize = jnp.dtype(slab.dtype).itemsize
    pack = _sublane_pack(slab.dtype)
    block_rows = _pick_block_rows(rows, w, itemsize, pack, _target_tile_bytes())
    params = dict(dimension_semantics=("parallel",))
    if "v5" in _device_kind():
        # v5e scoped-VMEM default is only 16 MiB; raise it so ~3 MiB tiles
        # (12 MiB double-buffered footprint) compile with headroom.
        params["vmem_limit_bytes"] = 64 << 20
    # NOTE: pipeline_mode=pl.Buffered(3) evaluated; kept at default double
    # buffering to preserve VMEM headroom across all three generations.
    return pl.pallas_call(
        _tile_copy_kernel,
        out_shape=jax.ShapeDtypeStruct((rows, w), slab.dtype),
        grid=(pl.cdiv(rows, block_rows),),
        in_specs=[pl.BlockSpec((block_rows, w), lambda i: (i, 0))],
        out_specs=pl.BlockSpec((block_rows, w), lambda i: (i, 0)),
        compiler_params=pltpu.CompilerParams(**params),
        cost_estimate=pl.CostEstimate(
            flops=0, transcendentals=0, bytes_accessed=2 * rows * w * itemsize),
    )(slab)


# ---------------------------------------------------------------------------
# Path selection (one-time probe of local HBM->HBM DMA support).
# ---------------------------------------------------------------------------
_DMA_OK = None


def _dma_path_supported():
    global _DMA_OK
    if _DMA_OK is None:
        try:
            p1 = jnp.arange(8 * 256, dtype=jnp.float32).reshape(8, 256)
            p2 = jnp.arange(105, dtype=jnp.float32).reshape(1, 105)
            o1 = jax.block_until_ready(_dma_copy_slab(p1))
            o2 = jax.block_until_ready(_dma_copy_slab(p2))
            _DMA_OK = bool(np.array_equal(np.asarray(o1), np.asarray(p1))
                           and np.array_equal(np.asarray(o2), np.asarray(p2)))
        except Exception:
            _DMA_OK = False
    return _DMA_OK


# ---------------------------------------------------------------------------
# Public wrapper.
# ---------------------------------------------------------------------------
def pallas_view(x, shape, materialize=True, use_dma=True):
    """Equivalent of torch `input.view(*shape)`.

    materialize=False -> true view semantics (metadata only, jnp.reshape).
    materialize=True  -> data movement done by a Pallas TPU kernel."""
    total = int(np.prod(x.shape))
    out_shape = _resolve_shape(total, shape)

    if not materialize or total == 0:
        return jnp.reshape(x, out_shape)

    w = _pick_width(total)

    if use_dma:
        if w is not None:
            slab = jnp.reshape(x, (total // w, w))
        else:
            # Ragged total: single whole-ref DMA of the flat stream — no pad,
            # no trailing slice, no extra HBM traffic.
            slab = jnp.reshape(x, (1, total))
        return jnp.reshape(_dma_copy_slab(slab), out_shape)

    # Tiled VMEM fallback.
    if w is not None:
        return jnp.reshape(_tiled_copy_slab(jnp.reshape(x, (total // w, w))),
                           out_shape)
    # Ragged + no-DMA corner: pad to a lane multiple, copy, slice back.
    # TODO(synk): could handle the sub-128 tail with a masked store instead.
    padded = ((total + 127) // 128) * 128
    flat = jnp.pad(jnp.reshape(x, (total,)), (0, padded - total))
    copied = _tiled_copy_slab(jnp.reshape(flat, (padded // 128, 128)))
    return jnp.reshape(jnp.reshape(copied, (padded,))[:total], out_shape)


class ViewPallas:
    """Mirror of the PyTorch `View` module (no parameters)."""

    def __init__(self, shape, materialize=True):
        self.shape = tuple(shape)
        self.materialize = materialize
        use_dma = _dma_path_supported() if materialize else False
        self._fn = jax.jit(functools.partial(
            pallas_view, shape=self.shape, materialize=materialize,
            use_dma=use_dma))

    def __call__(self, x):
        return self._fn(x)


if __name__ == "__main__":
    key = jax.random.PRNGKey(0)
    k1, k2, k3 = jax.random.split(key, 3)

    # Typical evalcnn use: flatten NCHW feature maps before a linear layer.
    x = jax.random.normal(k1, (2, 4, 16, 16), dtype=jnp.float32)
    out = jax.block_until_ready(ViewPallas((2, -1))(x))
    ref = jnp.reshape(x, (2, -1))
    assert out.shape == (2, 4 * 16 * 16), out.shape
    assert out.dtype == x.dtype
    np.testing.assert_array_equal(np.asarray(out), np.asarray(ref))

    # Ragged (non-128-divisible) total.
    x2 = jax.random.normal(k2, (3, 5, 7), dtype=jnp.float32)
    out2 = jax.block_until_ready(ViewPallas((5, -1))(x2))
    assert out2.shape == (5, 21), out2.shape
    np.testing.assert_array_equal(np.asarray(out2),
                                  np.asarray(jnp.reshape(x2, (5, -1))))

    # Larger feature-map flatten: exercises the multi-chunk (4 concurrent DMA)
    # path on an aligned slab.
    x3 = jax.random.normal(k3, (4, 64, 64, 64), dtype=jnp.float32)
    out3 = jax.block_until_ready(ViewPallas((4, -1))(x3))
    assert out3.shape == (4, 64 * 64 * 64), out3.shape
    np.testing.assert_array_equal(np.asarray(out3),
                                  np.asarray(jnp.reshape(x3, (4, -1))))

    print("KERNEL_OK")
</pallas_src>

<mosaic_0001>
module attributes {stable_mosaic.version = 11 : i64} {
  func.func @kernel(%arg0: memref<8x256xf32, #tpu.memory_space<any>>, %arg1: memref<8x256xf32, #tpu.memory_space<any>>, %arg2: memref<1x!tpu.dma_semaphore, #tpu.memory_space<semaphore_mem>>) attributes {dimension_semantics = [], scalar_prefetch = 0 : i64, scratch_operands = 1 : i64, tpu.core_type = #tpu.core_type<tc>} {
    %c0_i32 = arith.constant 0 : i32
    %0 = tpu.memref_slice %arg2[%c0_i32] : memref<1x!tpu.dma_semaphore, #tpu.memory_space<semaphore_mem>> -> memref<1x!tpu.dma_semaphore, #tpu.memory_space<semaphore_mem>>
    %1 = tpu.memref_squeeze %0 : memref<1x!tpu.dma_semaphore, #tpu.memory_space<semaphore_mem>> -> memref<!tpu.dma_semaphore, #tpu.memory_space<semaphore_mem>>
    tpu.enqueue_dma source(%arg0 : memref<8x256xf32, #tpu.memory_space<any>>) target(%arg1 : memref<8x256xf32, #tpu.memory_space<any>>) target_semaphore(%1 : memref<!tpu.dma_semaphore, #tpu.memory_space<semaphore_mem>>)
    %c0_i32_0 = arith.constant 0 : i32
    %2 = tpu.memref_slice %arg2[%c0_i32_0] : memref<1x!tpu.dma_semaphore, #tpu.memory_space<semaphore_mem>> -> memref<1x!tpu.dma_semaphore, #tpu.memory_space<semaphore_mem>>
    %3 = tpu.memref_squeeze %2 : memref<1x!tpu.dma_semaphore, #tpu.memory_space<semaphore_mem>> -> memref<!tpu.dma_semaphore, #tpu.memory_space<semaphore_mem>>
    tpu.wait_dma2 semaphore(%3 : memref<!tpu.dma_semaphore, #tpu.memory_space<semaphore_mem>>) src(%arg0 : memref<8x256xf32, #tpu.memory_space<any>>) dst(%arg1 : memref<8x256xf32, #tpu.memory_space<any>>)
    return
  }
}

module attributes {stable_mosaic.version = 11 : i64} {
  func.func @_tile_copy_kernel(%arg0: i32, %arg1: memref<1x2048xf32, #tpu.memory_space<vmem>>, %arg2: memref<1x2048xf32, #tpu.memory_space<vmem>>) attributes {dimension_semantics = [#tpu.dimension_semantics<parallel>], iteration_bounds = array<i64: 1>, scalar_prefetch = 0 : i64, scratch_operands = 0 : i64, tpu.core_type = #tpu.core_type<tc>, window_params = [{transform_indices = @transform_0, window_bounds = array<i64: 1, 2048>}, {transform_indices = @transform_1, window_bounds = array<i64: 1, 2048>}]} {
    %c0 = arith.constant 0 : index
    %c0_0 = arith.constant 0 : index
    %0 = vector.load %arg1[%c0, %c0_0] : memref<1x2048xf32, #tpu.memory_space<vmem>>, vector<1x2048xf32>
    %c0_1 = arith.constant 0 : index
    %c0_2 = arith.constant 0 : index
    %1 = vector.load %arg2[%c0_1, %c0_2] : memref<1x2048xf32, #tpu.memory_space<vmem>>, vector<1x2048xf32>
    tpu.vector_store %arg2[%c0_1, %c0_2], %0 {strides = array<i32>} : memref<1x2048xf32, #tpu.memory_space<vmem>>, vector<1x2048xf32>,
    return
  }
  func.func @transform_0(%arg0: i32) -> (i32, i32) {
    %c0_i32 = arith.constant 0 : i32
    %c0_i32_0 = arith.constant 0 : i32
    return %arg0, %c0_i32 : i32, i32
  }
  func.func @transform_1(%arg0: i32) -> (i32, i32) {
    %c0_i32 = arith.constant 0 : i32
    %c0_i32_0 = arith.constant 0 : i32
    return %arg0, %c0_i32 : i32, i32
  }
}

</mosaic_0001>

<bundles_post_ra>
// kernel: tpu_custom_call.1
= control target key start
LH: loop header
LB: loop body
LE: loop exit
PB: predicated region body
PF: predicated region fallthrough
CT: control target
= control target key end

     0   :  { %s35_s6 = smov [#allocation2]   ;;  %s36_s7 = smov [#allocation3]   ;;  %s54_s0 = inlined_call_operand.hbm [shape: f32[8,256], index: 0, kind: input, shape index: {}]   ;;  %s55_s1 = inlined_call_operand.hbm [shape: f32[8,256], index: 1, kind: output, shape index: {}]  }
   0x1   :  { %s37_s8 = smov 0  }
   0x2   :  { %18 = dma.general %s54_s0, 256, %s55_s1, %s35_s6, %s36_s7, [#allocation4], %s37_s8, 0  }
   0x3   :  { %33 = dma.done.wait [#allocation2], 256 }
   0x4   :  { %34 = vsyncadd [#allocation2], 4294967040 }
   0x5   :  { %23 = vsyncmov [#allocation2] }
   0x8   :  { %s24_s13 = vpop.sfrf %23 }
   0x9   :  { %p29_p0 = scmp.ne.s32.totalorder %s24_s13, 0 }
   0xb   :  { %28 = shalt.err (%p29_p0)  }

// kernel: pallas_view.1
= control target key start
LH: loop header
LB: loop body
LE: loop exit
PB: predicated region body
PF: predicated region fallthrough
CT: control target
= control target key end

     0   :  { %s38_s0 = inlined_call_operand.vmem [shape: f32[1,2048], index: 0, kind: input, shape index: {}]   ;;  %s39_s1 = inlined_call_operand.vmem [shape: f32[1,2048], index: 1, kind: output, shape index: {}]  }
   0x1   :  { %v8_v0 = vld [vmem:[%s38_s0] sm:$0xff]  ;;  %v9_v1 = vld [vmem:[%s38_s0 + $0x8] sm:$0xff] }
   0x2   :  { %10 = vst [vmem:[%s39_s1] sm:$0xff] %v8_v0  ;;  %11 = vst [vmem:[%s39_s1 + $0x8] sm:$0xff] %v9_v1 }

</bundles_post_ra>
